<compile_context>
chip_gen: v7x
topology: tpu7x:2x2x1
jax: 0.10.0
libtpu: 0.0.40
codegen_flags: <defaults>
</compile_context>

<pallas_src>
import random

import jax
import jax.numpy as jnp
from jax.experimental import pallas as pl
from jax.experimental.pallas import tpu as pltpu

LANE = 128
SUBLANE = 8


def _round_up(x, m):
    return ((x + m - 1) // m) * m


def _pad_axis(x, axis, new_size, value=0.0):
    pad = new_size - x.shape[axis]
    if pad <= 0:
        return x
    widths = [(0, 0)] * x.ndim
    widths[axis] = (0, pad)
    return jnp.pad(x, widths, constant_values=value)


# ----------------------------------------------------------------------------
# Kernel 1: fused bidirectional GRU encoder (single launch, no grid).
# gxf/gxb are the pre-computed (hoisted) input projections for each direction.
# The enc-side attention projection is fused into the output epilogue.
# ----------------------------------------------------------------------------
def _encoder_kernel(gxf_ref, gxb_ref, whh_f_ref, whh_b_ref, bhh_f_ref, bhh_b_ref,
                    attn_we_ref, attn_b_ref,
                    enc_out_ref, encproj_ref, hidden_ref):
    T, B, H3 = gxf_ref.shape
    H = H3 // 3

    whh_f = whh_f_ref[...]
    whh_b = whh_b_ref[...]
    bhh_f = bhh_f_ref[...]
    bhh_b = bhh_b_ref[...]
    attn_we = attn_we_ref[...]
    attn_b = attn_b_ref[...]

    def cell(gx_t, h, w, b):
        gh = jnp.dot(h, w, preferred_element_type=jnp.float32) + b
        # PyTorch GRU gate order: r, z, n
        r = jax.nn.sigmoid(gx_t[:, 0:H] + gh[:, 0:H])
        z = jax.nn.sigmoid(gx_t[:, H:2 * H] + gh[:, H:2 * H])
        n = jnp.tanh(gx_t[:, 2 * H:H3] + r * gh[:, 2 * H:H3])
        return (1.0 - z) * n + z * h

    h0 = jnp.zeros((B, H), jnp.float32)

    # forward direction: write hidden straight into the output ref (one live carry)
    def fwd_body(t, h):
        h = cell(gxf_ref[t], h, whh_f, bhh_f)
        enc_out_ref[t] = h
        return h

    h_fwd = jax.lax.fori_loop(0, T, fwd_body, h0)

    # backward direction: fuse the "sum of directions" add and the enc-side
    # attention projection into the output write.
    def bwd_body(i, h):
        t = T - 1 - i
        h = cell(gxb_ref[t], h, whh_b, bhh_b)
        o = enc_out_ref[t] + h
        enc_out_ref[t] = o
        encproj_ref[t] = jnp.dot(o, attn_we, preferred_element_type=jnp.float32) + attn_b
        return h

    h_bwd = jax.lax.fori_loop(0, T, bwd_body, h0)

    # bidirectional final hidden summed over directions (decoder init state),
    # matching hidden.view(n_layers, 2, B, H).sum(dim=1) in the reference.
    hidden_ref[...] = h_fwd + h_bwd


def encoder_bigru(gx_f, gx_b, whh_f, whh_b, bhh_f, bhh_b, attn_we, attn_b):
    """gx_{f,b}: (T, B, 3H) hoisted input projections ->
       (enc_out (T,B,H), encproj (T,B,H), hidden0 (B,H))."""
    T, B, H3 = gx_f.shape
    H = H3 // 3
    vmem = pl.BlockSpec(memory_space=pltpu.MemorySpace.VMEM)
    return pl.pallas_call(
        _encoder_kernel,
        out_shape=(jax.ShapeDtypeStruct((T, B, H), jnp.float32),
                   jax.ShapeDtypeStruct((T, B, H), jnp.float32),
                   jax.ShapeDtypeStruct((B, H), jnp.float32)),
        in_specs=[vmem] * 8,
        out_specs=(vmem, vmem, vmem),
    )(gx_f, gx_b, whh_f, whh_b, bhh_f, bhh_b, attn_we, attn_b)


# ----------------------------------------------------------------------------
# Kernel 2: the WHOLE decode loop as one un-gridded pallas_call; the step loop is
# an in-kernel lax.fori_loop with (hidden, prev-greedy-one-hot) as carries.
# Teacher-forcing decisions live in SMEM; teacher tokens are pre-embedded.
# All shapes arriving here are already padded: B -> multiple of 8, V -> mult of 128.
# ----------------------------------------------------------------------------
def _decoder_kernel(tf_ref,                                   # SMEM (S,) int32
                    trg_emb_ref, emb_tbl_ref, enc_ref, encproj_ref, h0_ref,
                    attn_wh_ref, attn_v_ref,
                    wih_e_ref, wih_c_ref, whh_ref, bih_ref, bhh_ref,
                    outw_h_ref, outw_c_ref, outb_ref,
                    logp_ref):                                # output (S, B, Vp)
    S, B, E = trg_emb_ref.shape
    _, T, H = enc_ref.shape
    Vp = outb_ref.shape[1]

    emb_tbl = emb_tbl_ref[...]
    enc = enc_ref[...]
    encproj = encproj_ref[...]
    attn_wh = attn_wh_ref[...]
    attn_v = attn_v_ref[...]
    wih_e = wih_e_ref[...]
    wih_c = wih_c_ref[...]
    whh = whh_ref[...]
    bih = bih_ref[...]
    bhh = bhh_ref[...]
    outw_h = outw_h_ref[...]
    outw_c = outw_c_ref[...]
    outb = outb_ref[...]
    iota_v = jax.lax.broadcasted_iota(jnp.int32, (B, Vp), 1)

    def step(s, carry):
        h, prev_oh = carry

        # --- token selection: teacher-forced embedded target vs prev greedy ---
        # TODO(synk): nn.Dropout on the decoder embedding is treated as eval-mode identity.
        tf_f = (tf_ref[s] > 0).astype(jnp.float32)             # exact 0.0 / 1.0
        greedy_emb = jnp.dot(prev_oh, emb_tbl, preferred_element_type=jnp.float32)
        emb = tf_f * trg_emb_ref[s] + (1.0 - tf_f) * greedy_emb   # (B, E)

        # --- attention (enc-side projection was hoisted into the encoder) ---
        hproj = jnp.dot(h, attn_wh, preferred_element_type=jnp.float32)   # (B, H)
        energy = jax.nn.relu(hproj[:, None, :] + encproj)                 # (B, T, H)
        scores = jnp.sum(energy * attn_v, axis=-1)                        # (B, T)
        scores = scores - jnp.max(scores, axis=-1, keepdims=True)
        e = jnp.exp(scores)
        attn = e * pl.reciprocal(jnp.sum(e, axis=-1, keepdims=True), approx=True)
        context = jnp.einsum('bqt,bth->bqh', attn[:, None, :], enc,
                             preferred_element_type=jnp.float32)[:, 0, :]  # (B, H)

        # --- GRU cell on [embedded ; context] (concat replaced by split matmuls) ---
        gx = (jnp.dot(emb, wih_e, preferred_element_type=jnp.float32)
              + jnp.dot(context, wih_c, preferred_element_type=jnp.float32) + bih)
        gh = jnp.dot(h, whh, preferred_element_type=jnp.float32) + bhh
        r = jax.nn.sigmoid(gx[:, 0:H] + gh[:, 0:H])
        z = jax.nn.sigmoid(gx[:, H:2 * H] + gh[:, H:2 * H])
        n = jnp.tanh(gx[:, 2 * H:3 * H] + r * gh[:, 2 * H:3 * H])
        h_new = (1.0 - z) * n + z * h                                      # (B, H)

        # --- output projection + log_softmax (split matmuls, lane-dense Vp) ---
        logits = (jnp.dot(h_new, outw_h, preferred_element_type=jnp.float32)
                  + jnp.dot(context, outw_c, preferred_element_type=jnp.float32) + outb)
        m = jnp.max(logits, axis=-1, keepdims=True)
        lse = jnp.log(jnp.sum(jnp.exp(logits - m), axis=-1, keepdims=True)) + m
        logp_ref[s] = logits - lse

        # --- greedy token for the next step (reuse m; first-index tie-break) ---
        idx = jnp.min(jnp.where(logits == m, iota_v, Vp), axis=-1, keepdims=True)  # (B,1)
        new_oh = (iota_v == idx).astype(jnp.float32)
        return h_new, new_oh

    h0 = h0_ref[...]
    oh0 = jnp.zeros((B, Vp), jnp.float32)
    jax.lax.fori_loop(0, S, step, (h0, oh0))


def decoder_loop(tf_mask, trg_emb, emb_tbl, enc_bth, encproj_bth, h0,
                 attn_wh, attn_v, wih_e, wih_c, whh, bih, bhh,
                 outw_h, outw_c, outb):
    S, B, _ = trg_emb.shape
    Vp = outb.shape[1]
    vmem = pl.BlockSpec(memory_space=pltpu.MemorySpace.VMEM)
    smem = pl.BlockSpec(memory_space=pltpu.MemorySpace.SMEM)
    # Everything fits comfortably in VMEM at these sizes; for much larger
    # (S, B, V) one would reintroduce a grid over steps / tile the vocab.
    return pl.pallas_call(
        _decoder_kernel,
        out_shape=jax.ShapeDtypeStruct((S, B, Vp), jnp.float32),
        in_specs=[smem] + [vmem] * 15,
        out_specs=vmem,
    )(tf_mask, trg_emb, emb_tbl, enc_bth, encproj_bth, h0,
      attn_wh, attn_v, wih_e, wih_c, whh, bih, bhh, outw_h, outw_c, outb)


# ----------------------------------------------------------------------------
# Seq2Seq.forward
# ----------------------------------------------------------------------------
def make_tf_mask(max_len, teacher_forcing_ratio):
    """One coin flip per decode iteration, exactly like `random.random() < ratio`
    in the reference.  Step 0 always consumes trg[0]."""
    S = max_len - 1
    flags = [1 if random.random() < teacher_forcing_ratio else 0 for _ in range(S)]
    return jnp.array([1] + flags[:-1], dtype=jnp.int32)          # (S,)


def seq2seq_forward(src, trg, pk, teacher_forcing_ratio=0.5, tf_mask=None):
    max_len, B = trg.shape
    V = pk["v_trg"]
    S = max_len - 1
    B_pad = _round_up(B, SUBLANE)

    if tf_mask is None:
        tf_mask = make_tf_mask(max_len, teacher_forcing_ratio)

    # ---- encoder (fused bidirectional GRU kernel) ----
    emb = jnp.take(pk["enc_embed"], src, axis=0)                 # (T, B, E)
    emb = _pad_axis(emb, 1, B_pad)                               # (T, Bp, E)
    T = emb.shape[0]
    H3 = pk["enc_whh_f"].shape[1]
    # Hoisted, time-parallel input projection for BOTH directions: one big matmul.
    gx = jnp.dot(emb.reshape(T * B_pad, -1), pk["enc_wih"]) + pk["enc_bih"]
    gx_f = gx[:, :H3].reshape(T, B_pad, H3)
    gx_b = gx[:, H3:].reshape(T, B_pad, H3)

    enc_tbh, encproj_tbh, hidden0 = encoder_bigru(
        gx_f, gx_b, pk["enc_whh_f"], pk["enc_whh_b"], pk["enc_bhh_f"], pk["enc_bhh_b"],
        pk["attn_we"], pk["attn_b"])
    enc_bth = jnp.transpose(enc_tbh, (1, 0, 2))                  # (Bp, T, H), once
    encproj_bth = jnp.transpose(encproj_tbh, (1, 0, 2))          # (Bp, T, H), once

    # ---- fused decode loop (one un-gridded kernel over all steps) ----
    trg_emb = jnp.take(pk["dec_embed"], trg[:S], axis=0)         # (S, B, E)
    trg_emb = _pad_axis(trg_emb, 1, B_pad)                       # (S, Bp, E)
    logp_pad = decoder_loop(tf_mask, trg_emb, pk["dec_embed"],
                            enc_bth, encproj_bth, hidden0,
                            pk["attn_wh"], pk["attn_v"],
                            pk["dec_wih_e"], pk["dec_wih_c"], pk["dec_whh"],
                            pk["dec_bih"], pk["dec_bhh"],
                            pk["dec_outw_h"], pk["dec_outw_c"], pk["dec_out_b"])
    logp = logp_pad[:, :B, :V]                                   # strip pad
    # outputs[0] stays zero, exactly like torch.zeros(...) in the reference.
    return jnp.concatenate([jnp.zeros((1, B, V), jnp.float32), logp], axis=0)


# ----------------------------------------------------------------------------
# Parameters: created in PyTorch layout, then packed (pre-transposed / pre-split /
# padded) once on the host into the kernel-friendly layout.
# ----------------------------------------------------------------------------
def make_params(key, v_src, v_trg, embed, hidden):
    names_shapes = [
        ("enc_embed", (v_src, embed)),
        ("enc_wih_f", (3 * hidden, embed)), ("enc_whh_f", (3 * hidden, hidden)),
        ("enc_bih_f", (3 * hidden,)), ("enc_bhh_f", (3 * hidden,)),
        ("enc_wih_b", (3 * hidden, embed)), ("enc_whh_b", (3 * hidden, hidden)),
        ("enc_bih_b", (3 * hidden,)), ("enc_bhh_b", (3 * hidden,)),
        ("dec_embed", (v_trg, embed)),
        ("attn_w", (hidden, 2 * hidden)), ("attn_b", (hidden,)),
        ("attn_v", (hidden,)),
        ("dec_wih", (3 * hidden, embed + hidden)), ("dec_whh", (3 * hidden, hidden)),
        ("dec_bih", (3 * hidden,)), ("dec_bhh", (3 * hidden,)),
        ("dec_out_w", (v_trg, 2 * hidden)), ("dec_out_b", (v_trg,)),
    ]
    keys = jax.random.split(key, len(names_shapes))
    return {name: 0.1 * jax.random.normal(k, shape, jnp.float32)
            for (name, shape), k in zip(names_shapes, keys)}


def pack_params(p, hidden):
    H = hidden
    E = p["enc_embed"].shape[1]
    V = p["dec_out_w"].shape[0]
    Vp = _round_up(V, LANE)
    return {
        "v_trg": V,
        "enc_embed": p["enc_embed"],
        "enc_wih": jnp.concatenate([p["enc_wih_f"].T, p["enc_wih_b"].T], axis=1),  # (E,6H)
        "enc_bih": jnp.concatenate([p["enc_bih_f"], p["enc_bih_b"]])[None, :],     # (1,6H)
        "enc_whh_f": p["enc_whh_f"].T,          # (H, 3H)
        "enc_whh_b": p["enc_whh_b"].T,          # (H, 3H)
        "enc_bhh_f": p["enc_bhh_f"][None, :],   # (1, 3H)
        "enc_bhh_b": p["enc_bhh_b"][None, :],   # (1, 3H)
        # decoder embedding table, vocab-padded (padded rows never selected)
        "dec_embed": jnp.pad(p["dec_embed"], ((0, Vp - V), (0, 0))),               # (Vp, E)
        "attn_wh": p["attn_w"][:, :H].T,        # (H, H) — acts on decoder hidden
        "attn_we": p["attn_w"][:, H:].T,        # (H, H) — acts on enc outputs (fused)
        "attn_b": p["attn_b"][None, :],         # (1, H)
        "attn_v": p["attn_v"][None, :],         # (1, H)
        # decoder GRU input weights, pre-split to avoid in-kernel concat
        "dec_wih_e": p["dec_wih"][:, :E].T,     # (E, 3H) — acts on embedded token
        "dec_wih_c": p["dec_wih"][:, E:].T,     # (H, 3H) — acts on context
        "dec_whh": p["dec_whh"].T,              # (H, 3H)
        "dec_bih": p["dec_bih"][None, :],       # (1, 3H)
        "dec_bhh": p["dec_bhh"][None, :],       # (1, 3H)
        # output projection, pre-split + vocab-padded (lane-dense)
        "dec_outw_h": jnp.pad(p["dec_out_w"][:, :H].T, ((0, 0), (0, Vp - V))),     # (H, Vp)
        "dec_outw_c": jnp.pad(p["dec_out_w"][:, H:].T, ((0, 0), (0, Vp - V))),     # (H, Vp)
        # padded bias columns forced very negative so argmax / softmax ignore them
        "dec_out_b": jnp.pad(p["dec_out_b"][None, :], ((0, 0), (0, Vp - V)),
                             constant_values=-1e9),                                # (1, Vp)
    }


# ----------------------------------------------------------------------------
# Pure-JAX reference (mirror of the PyTorch math) for a numerical self-check.
# ----------------------------------------------------------------------------
def _gru_cell_ref(x, h, w_ih, w_hh, b_ih, b_hh):
    H = h.shape[-1]
    gx = x @ w_ih.T + b_ih
    gh = h @ w_hh.T + b_hh
    r = jax.nn.sigmoid(gx[:, :H] + gh[:, :H])
    z = jax.nn.sigmoid(gx[:, H:2 * H] + gh[:, H:2 * H])
    n = jnp.tanh(gx[:, 2 * H:] + r * gh[:, 2 * H:])
    return (1.0 - z) * n + z * h


def _reference_forward(src, trg, p, tf_mask):
    T, B = src.shape
    max_len = trg.shape[0]
    H = p["enc_whh_f"].shape[1]
    V = p["dec_out_w"].shape[0]

    emb = p["enc_embed"][src]                        # (T, B, E)
    h = jnp.zeros((B, H), jnp.float32)
    outs_f = []
    for t in range(T):
        h = _gru_cell_ref(emb[t], h, p["enc_wih_f"], p["enc_whh_f"],
                          p["enc_bih_f"], p["enc_bhh_f"])
        outs_f.append(h)
    h = jnp.zeros((B, H), jnp.float32)
    outs_b = [None] * T
    for i in range(T):
        t = T - 1 - i
        h = _gru_cell_ref(emb[t], h, p["enc_wih_b"], p["enc_whh_b"],
                          p["enc_bih_b"], p["enc_bhh_b"])
        outs_b[t] = h
    enc_bth = jnp.stack([outs_f[t] + outs_b[t] for t in range(T)], axis=1)  # (B, T, H)
    hidden = outs_f[-1] + outs_b[0]

    outputs = [jnp.zeros((B, V), jnp.float32)]
    prev_top1 = jnp.zeros((B,), jnp.int32)
    for s in range(max_len - 1):
        tok = jnp.where(tf_mask[s] > 0, trg[s], prev_top1)
        demb = p["dec_embed"][tok]
        h_rep = jnp.broadcast_to(hidden[:, None, :], enc_bth.shape)
        cat = jnp.concatenate([h_rep, enc_bth], axis=-1)
        energy = jax.nn.relu(cat @ p["attn_w"].T + p["attn_b"])
        sc = jnp.sum(energy * p["attn_v"], axis=-1)
        sc = sc - sc.max(axis=1, keepdims=True)
        a = jnp.exp(sc)
        a = a / a.sum(axis=1, keepdims=True)
        ctx = jnp.sum(a[:, :, None] * enc_bth, axis=1)
        rnn_in = jnp.concatenate([demb, ctx], axis=-1)
        hidden = _gru_cell_ref(rnn_in, hidden, p["dec_wih"], p["dec_whh"],
                               p["dec_bih"], p["dec_bhh"])
        logits = jnp.concatenate([hidden, ctx], axis=-1) @ p["dec_out_w"].T + p["dec_out_b"]
        logp = jax.nn.log_softmax(logits, axis=-1)
        outputs.append(logp)
        prev_top1 = jnp.argmax(logp, axis=1).astype(jnp.int32)
    return jnp.stack(outputs, axis=0)


if __name__ == "__main__":
    random.seed(0)  # deterministic teacher-forcing coin flips

    B, T_SRC, T_TRG = 2, 10, 8
    EMBED, HIDDEN = 32, 32
    V_SRC, V_TRG = 40, 48

    key = jax.random.PRNGKey(0)
    k_params, k_src, k_trg = jax.random.split(key, 3)
    raw_params = make_params(k_params, V_SRC, V_TRG, EMBED, HIDDEN)
    packed = pack_params(raw_params, HIDDEN)

    src = jax.random.randint(k_src, (T_SRC, B), 0, V_SRC, dtype=jnp.int32)
    trg = jax.random.randint(k_trg, (T_TRG, B), 0, V_TRG, dtype=jnp.int32)

    tf_mask = make_tf_mask(T_TRG, teacher_forcing_ratio=0.5)
    outputs = seq2seq_forward(src, trg, packed, teacher_forcing_ratio=0.5,
                              tf_mask=tf_mask)
    jax.block_until_ready(outputs)
    assert outputs.shape == (T_TRG, B, V_TRG)

    ref = _reference_forward(src, trg, raw_params, tf_mask)
    max_err = float(jnp.max(jnp.abs(outputs - ref)))
    # slightly loose tolerance: pl.reciprocal(approx=True) in the softmax denom
    assert max_err < 5e-3, max_err

    print("KERNEL_OK")
</pallas_src>

<mosaic_0001>
module attributes {stable_mosaic.version = 11 : i64} {
  func.func @_encoder_kernel(%arg0: memref<10x8x96xf32, #tpu.memory_space<vmem>>, %arg1: memref<10x8x96xf32, #tpu.memory_space<vmem>>, %arg2: memref<32x96xf32, #tpu.memory_space<vmem>>, %arg3: memref<32x96xf32, #tpu.memory_space<vmem>>, %arg4: memref<1x96xf32, #tpu.memory_space<vmem>>, %arg5: memref<1x96xf32, #tpu.memory_space<vmem>>, %arg6: memref<32x32xf32, #tpu.memory_space<vmem>>, %arg7: memref<1x32xf32, #tpu.memory_space<vmem>>, %arg8: memref<10x8x32xf32, #tpu.memory_space<vmem>>, %arg9: memref<10x8x32xf32, #tpu.memory_space<vmem>>, %arg10: memref<8x32xf32, #tpu.memory_space<vmem>>) attributes {dimension_semantics = [], scalar_prefetch = 0 : i64, scratch_operands = 0 : i64, tpu.core_type = #tpu.core_type<tc>} {
    %c0 = arith.constant 0 : index
    %c0_0 = arith.constant 0 : index
    %0 = vector.load %arg2[%c0, %c0_0] : memref<32x96xf32, #tpu.memory_space<vmem>>, vector<32x96xf32>
    %c0_1 = arith.constant 0 : index
    %c0_2 = arith.constant 0 : index
    %1 = vector.load %arg3[%c0_1, %c0_2] : memref<32x96xf32, #tpu.memory_space<vmem>>, vector<32x96xf32>
    %c0_3 = arith.constant 0 : index
    %c0_4 = arith.constant 0 : index
    %2 = vector.load %arg4[%c0_3, %c0_4] : memref<1x96xf32, #tpu.memory_space<vmem>>, vector<1x96xf32>
    %c0_5 = arith.constant 0 : index
    %c0_6 = arith.constant 0 : index
    %3 = vector.load %arg5[%c0_5, %c0_6] : memref<1x96xf32, #tpu.memory_space<vmem>>, vector<1x96xf32>
    %c0_7 = arith.constant 0 : index
    %c0_8 = arith.constant 0 : index
    %4 = vector.load %arg6[%c0_7, %c0_8] : memref<32x32xf32, #tpu.memory_space<vmem>>, vector<32x32xf32>
    %c0_9 = arith.constant 0 : index
    %c0_10 = arith.constant 0 : index
    %5 = vector.load %arg7[%c0_9, %c0_10] : memref<1x32xf32, #tpu.memory_space<vmem>>, vector<1x32xf32>
    %cst = arith.constant 0.000000e+00 : f32
    %6 = vector.broadcast %cst : f32 to vector<8x32xf32>
    %c0_i32 = arith.constant 0 : i32
    %c10_i32 = arith.constant 10 : i32
    %7 = arith.addi %c0_i32, %c10_i32 : i32
    %c1_i32 = arith.constant 1 : i32
    %8 = scf.for %arg11 = %c0_i32 to %7 step %c1_i32 iter_args(%arg12 = %6) -> (vector<8x32xf32>)  : i32 {
      %13 = arith.index_cast %arg11 : i32 to index
      %c0_18 = arith.constant 0 : index
      %c0_19 = arith.constant 0 : index
      %14 = vector.load %arg0[%13, %c0_18, %c0_19] : memref<10x8x96xf32, #tpu.memory_space<vmem>>, vector<1x8x96xf32>
      %15 = vector.shape_cast %14 : vector<1x8x96xf32> to vector<8x96xf32>
      %cst_20 = arith.constant dense<0.000000e+00> : vector<8x96xf32>
      %16 = tpu.matmul %arg12, %0, %cst_20 {dimension_numbers = #tpu.dot_dimension_numbers<[1], [0], [0], [1], [0, 0, 1, 1], [], []>} : vector<8x32xf32>, vector<32x96xf32>, vector<8x96xf32> -> vector<8x96xf32>
      %17 = vector.broadcast %2 : vector<1x96xf32> to vector<8x96xf32>
      %18 = arith.addf %16, %17 : vector<8x96xf32>
      %19 = vector.extract_strided_slice %15 {offsets = [0, 0], sizes = [8, 32], strides = [1, 1]} : vector<8x96xf32> to vector<8x32xf32>
      %20 = vector.extract_strided_slice %18 {offsets = [0, 0], sizes = [8, 32], strides = [1, 1]} : vector<8x96xf32> to vector<8x32xf32>
      %21 = arith.addf %19, %20 : vector<8x32xf32>
      %22 = arith.negf %21 : vector<8x32xf32>
      %23 = math.exp %22 : vector<8x32xf32>
      %cst_21 = arith.constant 1.000000e+00 : f32
      %24 = vector.broadcast %cst_21 : f32 to vector<8x32xf32>
      %25 = arith.addf %24, %23 : vector<8x32xf32>
      %26 = arith.divf %24, %25 : vector<8x32xf32>
      %27 = vector.extract_strided_slice %15 {offsets = [0, 32], sizes = [8, 32], strides = [1, 1]} : vector<8x96xf32> to vector<8x32xf32>
      %28 = vector.extract_strided_slice %18 {offsets = [0, 32], sizes = [8, 32], strides = [1, 1]} : vector<8x96xf32> to vector<8x32xf32>
      %29 = arith.addf %27, %28 : vector<8x32xf32>
      %30 = arith.negf %29 : vector<8x32xf32>
      %31 = math.exp %30 : vector<8x32xf32>
      %cst_22 = arith.constant 1.000000e+00 : f32
      %32 = vector.broadcast %cst_22 : f32 to vector<8x32xf32>
      %33 = arith.addf %32, %31 : vector<8x32xf32>
      %34 = arith.divf %32, %33 : vector<8x32xf32>
      %35 = vector.extract_strided_slice %15 {offsets = [0, 64], sizes = [8, 32], strides = [1, 1]} : vector<8x96xf32> to vector<8x32xf32>
      %36 = vector.extract_strided_slice %18 {offsets = [0, 64], sizes = [8, 32], strides = [1, 1]} : vector<8x96xf32> to vector<8x32xf32>
      %37 = arith.mulf %26, %36 : vector<8x32xf32>
      %38 = arith.addf %35, %37 : vector<8x32xf32>
      %39 = math.tanh %38 : vector<8x32xf32>
      %cst_23 = arith.constant 1.000000e+00 : f32
      %40 = vector.broadcast %cst_23 : f32 to vector<8x32xf32>
      %41 = arith.subf %40, %34 : vector<8x32xf32>
      %42 = arith.mulf %41, %39 : vector<8x32xf32>
      %43 = arith.mulf %34, %arg12 : vector<8x32xf32>
      %44 = arith.addf %42, %43 : vector<8x32xf32>
      %45 = arith.index_cast %arg11 : i32 to index
      %c0_24 = arith.constant 0 : index
      %c0_25 = arith.constant 0 : index
      %46 = vector.load %arg8[%45, %c0_24, %c0_25] : memref<10x8x32xf32, #tpu.memory_space<vmem>>, vector<1x8x32xf32>
      %47 = vector.shape_cast %46 : vector<1x8x32xf32> to vector<8x32xf32>
      %48 = vector.shape_cast %44 : vector<8x32xf32> to vector<1x8x32xf32>
      tpu.vector_store %arg8[%45, %c0_24, %c0_25], %48 {strides = array<i32>} : memref<10x8x32xf32, #tpu.memory_space<vmem>>, vector<1x8x32xf32>,
      scf.yield %44 : vector<8x32xf32>
    }
    %c10_i32_11 = arith.constant 10 : i32
    %c0_i32_12 = arith.constant 0 : i32
    %c10_i32_13 = arith.constant 10 : i32
    %9 = arith.addi %c0_i32_12, %c10_i32_13 : i32
    %c1_i32_14 = arith.constant 1 : i32
    %10 = scf.for %arg11 = %c0_i32_12 to %9 step %c1_i32_14 iter_args(%arg12 = %6) -> (vector<8x32xf32>)  : i32 {
      %c9_i32 = arith.constant 9 : i32
      %13 = arith.subi %c9_i32, %arg11 : i32
      %14 = arith.index_cast %13 : i32 to index
      %c0_18 = arith.constant 0 : index
      %c0_19 = arith.constant 0 : index
      %15 = vector.load %arg1[%14, %c0_18, %c0_19] : memref<10x8x96xf32, #tpu.memory_space<vmem>>, vector<1x8x96xf32>
      %16 = vector.shape_cast %15 : vector<1x8x96xf32> to vector<8x96xf32>
      %cst_20 = arith.constant dense<0.000000e+00> : vector<8x96xf32>
      %17 = tpu.matmul %arg12, %1, %cst_20 {dimension_numbers = #tpu.dot_dimension_numbers<[1], [0], [0], [1], [0, 0, 1, 1], [], []>} : vector<8x32xf32>, vector<32x96xf32>, vector<8x96xf32> -> vector<8x96xf32>
      %18 = vector.broadcast %3 : vector<1x96xf32> to vector<8x96xf32>
      %19 = arith.addf %17, %18 : vector<8x96xf32>
      %20 = vector.extract_strided_slice %16 {offsets = [0, 0], sizes = [8, 32], strides = [1, 1]} : vector<8x96xf32> to vector<8x32xf32>
      %21 = vector.extract_strided_slice %19 {offsets = [0, 0], sizes = [8, 32], strides = [1, 1]} : vector<8x96xf32> to vector<8x32xf32>
      %22 = arith.addf %20, %21 : vector<8x32xf32>
      %23 = arith.negf %22 : vector<8x32xf32>
      %24 = math.exp %23 : vector<8x32xf32>
      %cst_21 = arith.constant 1.000000e+00 : f32
      %25 = vector.broadcast %cst_21 : f32 to vector<8x32xf32>
      %26 = arith.addf %25, %24 : vector<8x32xf32>
      %27 = arith.divf %25, %26 : vector<8x32xf32>
      %28 = vector.extract_strided_slice %16 {offsets = [0, 32], sizes = [8, 32], strides = [1, 1]} : vector<8x96xf32> to vector<8x32xf32>
      %29 = vector.extract_strided_slice %19 {offsets = [0, 32], sizes = [8, 32], strides = [1, 1]} : vector<8x96xf32> to vector<8x32xf32>
      %30 = arith.addf %28, %29 : vector<8x32xf32>
      %31 = arith.negf %30 : vector<8x32xf32>
      %32 = math.exp %31 : vector<8x32xf32>
      %cst_22 = arith.constant 1.000000e+00 : f32
      %33 = vector.broadcast %cst_22 : f32 to vector<8x32xf32>
      %34 = arith.addf %33, %32 : vector<8x32xf32>
      %35 = arith.divf %33, %34 : vector<8x32xf32>
      %36 = vector.extract_strided_slice %16 {offsets = [0, 64], sizes = [8, 32], strides = [1, 1]} : vector<8x96xf32> to vector<8x32xf32>
      %37 = vector.extract_strided_slice %19 {offsets = [0, 64], sizes = [8, 32], strides = [1, 1]} : vector<8x96xf32> to vector<8x32xf32>
      %38 = arith.mulf %27, %37 : vector<8x32xf32>
      %39 = arith.addf %36, %38 : vector<8x32xf32>
      %40 = math.tanh %39 : vector<8x32xf32>
      %cst_23 = arith.constant 1.000000e+00 : f32
      %41 = vector.broadcast %cst_23 : f32 to vector<8x32xf32>
      %42 = arith.subf %41, %35 : vector<8x32xf32>
      %43 = arith.mulf %42, %40 : vector<8x32xf32>
      %44 = arith.mulf %35, %arg12 : vector<8x32xf32>
      %45 = arith.addf %43, %44 : vector<8x32xf32>
      %46 = arith.index_cast %13 : i32 to index
      %c0_24 = arith.constant 0 : index
      %c0_25 = arith.constant 0 : index
      %47 = vector.load %arg8[%46, %c0_24, %c0_25] : memref<10x8x32xf32, #tpu.memory_space<vmem>>, vector<1x8x32xf32>
      %48 = vector.shape_cast %47 : vector<1x8x32xf32> to vector<8x32xf32>
      %49 = arith.addf %48, %45 : vector<8x32xf32>
      %50 = arith.index_cast %13 : i32 to index
      %c0_26 = arith.constant 0 : index
      %c0_27 = arith.constant 0 : index
      %51 = vector.load %arg8[%50, %c0_26, %c0_27] : memref<10x8x32xf32, #tpu.memory_space<vmem>>, vector<1x8x32xf32>
      %52 = vector.shape_cast %51 : vector<1x8x32xf32> to vector<8x32xf32>
      %53 = vector.shape_cast %49 : vector<8x32xf32> to vector<1x8x32xf32>
      tpu.vector_store %arg8[%50, %c0_26, %c0_27], %53 {strides = array<i32>} : memref<10x8x32xf32, #tpu.memory_space<vmem>>, vector<1x8x32xf32>,
      %cst_28 = arith.constant dense<0.000000e+00> : vector<8x32xf32>
      %54 = tpu.matmul %49, %4, %cst_28 {dimension_numbers = #tpu.dot_dimension_numbers<[1], [0], [0], [1], [0, 0, 1, 1], [], []>} : vector<8x32xf32>, vector<32x32xf32>, vector<8x32xf32> -> vector<8x32xf32>
      %55 = vector.broadcast %5 : vector<1x32xf32> to vector<8x32xf32>
      %56 = arith.addf %54, %55 : vector<8x32xf32>
      %57 = arith.index_cast %13 : i32 to index
      %c0_29 = arith.constant 0 : index
      %c0_30 = arith.constant 0 : index
      %58 = vector.load %arg9[%57, %c0_29, %c0_30] : memref<10x8x32xf32, #tpu.memory_space<vmem>>, vector<1x8x32xf32>
      %59 = vector.shape_cast %58 : vector<1x8x32xf32> to vector<8x32xf32>
      %60 = vector.shape_cast %56 : vector<8x32xf32> to vector<1x8x32xf32>
      tpu.vector_store %arg9[%57, %c0_29, %c0_30], %60 {strides = array<i32>} : memref<10x8x32xf32, #tpu.memory_space<vmem>>, vector<1x8x32xf32>,
      scf.yield %45 : vector<8x32xf32>
    }
    %c10_i32_15 = arith.constant 10 : i32
    %11 = arith.addf %8, %10 : vector<8x32xf32>
    %c0_16 = arith.constant 0 : index
    %c0_17 = arith.constant 0 : index
    %12 = vector.load %arg10[%c0_16, %c0_17] : memref<8x32xf32, #tpu.memory_space<vmem>>, vector<8x32xf32>
    tpu.vector_store %arg10[%c0_16, %c0_17], %11 {strides = array<i32>} : memref<8x32xf32, #tpu.memory_space<vmem>>, vector<8x32xf32>,
    return
  }
}

</mosaic_0001>

<bundles_post_ra>
// kernel: tpu_custom_call.1
= control target key start
LH: loop header
LB: loop body
LE: loop exit
PB: predicated region body
PF: predicated region fallthrough
CT: control target
= control target key end

     0   :  { %16 = vsyncpa [#allocation3], 0  ;;  %s1196_s0 = inlined_call_operand.hbm [shape: f32[10,8,96], index: 0, kind: input, shape index: {}]   ;;  %s1197_s1 = inlined_call_operand.hbm [shape: f32[10,8,96], index: 1, kind: input, shape index: {}]   ;;  %s1198_s2 = inlined_call_operand.hbm [shape: f32[32,96], index: 2, kind: input, shape index: {}]   ;;  %s1199_s3 = inlined_call_operand.hbm [shape: f32[32,96], index: 3, kind: input, shape index: {}]   ;;  %s1200_s4 = inlined_call_operand.vmem [shape: f32[1,96], index: 4, kind: input, shape index: {}]   ;;  %s1201_s5 = inlined_call_operand.vmem [shape: f32[1,96], index: 5, kind: input, shape index: {}]   ;;  %s1202_s6 = inlined_call_operand.hbm [shape: f32[32,32], index: 6, kind: input, shape index: {}]   ;;  %s1203_s7 = inlined_call_operand.vmem [shape: f32[1,32], index: 7, kind: input, shape index: {}]   ;;  %s1204_s8 = inlined_call_operand.hbm [shape: f32[10,8,32], index: 8, kind: output, shape index: {0}]   ;;  %s1205_s9 = inlined_call_operand.hbm [shape: f32[10,8,32], index: 9, kind: output, shape index: {1}]   ;;  %s1206_s10 = inlined_call_operand.hbm [shape: f32[8,32], index: 10, kind: output, shape index: {2}]  }
   0x1   :  { %17 = vsyncpa [#allocation6], 0 }
   0x2   :  { %18 = vsyncpa [#allocation9], 0 }
   0x3   :  { %19 = vsyncpa [#allocation4], 0 }
   0x4   :  { %20 = vsyncpa [#allocation13], 0  ;;  %s889_s13 = smov [#allocation5]   ;;  %s890_s15 = smov [#allocation8]  }
   0x5   :  { %s38_s14 = sshll.u32 %s889_s13, 4  ;;  %s62_s16 = sshll.u32 %s890_s15, 4  ;;  %s39_s14 = int_to_ptr.vmem [resolvable:$true] %s38_s14  ;;  %s965_s16 = int_to_ptr.vmem [resolvable:$true] %s62_s16 }
   0x6   :  { %s671_s19 = scalar_lea.hbm %s1197_s1, 1280 }
   0x7   :  { %p672_p0 = scmp.ne.s32.totalorder %s1197_s1, %s671_s19  ;;  %p675_p1 = scmp.lt.u32.totalorder %s671_s19, %s1197_s1 }
   0x9   :  { %p677_p2 = pnand %p675_p1, %p672_p0 }
   0xb   :  { %680 = shalt.err (!%p677_p2)
}
   0xc   :  { %s681_s24 = scalar_lea.vmem %s39_s14, 1280  ;;  %p686_p4 = scmp.lt.s32.totalorder %s39_s14, %s39_s14 }
   0xd   :  { %p682_p3 = scmp.ne.s32.totalorder %s39_s14, %s681_s24  ;;  %p687_p5 = scmp.lt.s32.totalorder %s681_s24, %s681_s24 }
   0xf   :  { %p688_p6 = por %p687_p5, %p686_p4 }
  0x11   :  { %p689_p7 = pnand %p688_p6, %p682_p3 }
  0x13   :  { %692 = shalt.err (!%p689_p7)
}
  0x14   :  { %s891_s25 = smov 128   ;;  %s892_s26 = smov 8  }
  0x15   :  { %44 = dma.hbm_to_vmem [thread:$0]  %s1197_s1, 1280, %s39_s14, [#allocation6], %s891_s25, %s891_s25, %s892_s26  }
  0x16   :  { %s693_s11 = scalar_lea.hbm %s1199_s3, 512 }
  0x17   :  { %p694_p8 = scmp.ne.s32.totalorder %s1199_s3, %s693_s11  ;;  %p697_p9 = scmp.lt.u32.totalorder %s693_s11, %s1199_s3 }
  0x19   :  { %p699_p10 = pnand %p697_p9, %p694_p8 }
  0x1b   :  { %702 = shalt.err (!%p699_p10)
}
  0x1c   :  { %s703_s18 = scalar_lea.vmem %s965_s16, 512  ;;  %p708_p12 = scmp.lt.s32.totalorder %s965_s16, %s965_s16 }
  0x1d   :  { %p704_p11 = scmp.ne.s32.totalorder %s965_s16, %s703_s18  ;;  %p709_p13 = scmp.lt.s32.totalorder %s703_s18, %s703_s18 }
  0x1f   :  { %p710_p0 = por %p709_p13, %p708_p12 }
  0x21   :  { %p711_p1 = pnand %p710_p0, %p704_p11 }
  0x23   :  { %714 = shalt.err (!%p711_p1)
}
  0x24   :  { %68 = dma.hbm_to_vmem [thread:$0]  %s1199_s3, 512, %s965_s16, [#allocation9], %s891_s25, %s891_s25, %s892_s26  }
  0x25   :  { %s893_s19 = smov [#allocation2]   ;;  %s894_s21 = smov [#allocation7]  }
  0x26   :  { %s26_s20 = sshll.u32 %s893_s19, 4  ;;  %s50_s22 = sshll.u32 %s894_s21, 4  ;;  %s27_s20 = int_to_ptr.vmem [resolvable:$true] %s26_s20  ;;  %s1002_s22 = int_to_ptr.vmem [resolvable:$true] %s50_s22 }
  0x27   :  { %s715_s27 = scalar_lea.hbm %s1196_s0, 1280 }
  0x28   :  { %p716_p2 = scmp.ne.s32.totalorder %s1196_s0, %s715_s27  ;;  %p719_p3 = scmp.lt.u32.totalorder %s715_s27, %s1196_s0 }
  0x2a   :  { %p721_p4 = pnand %p719_p3, %p716_p2 }
  0x2c   :  { %724 = shalt.err (!%p721_p4)
}
  0x2d   :  { %s725_s3 = scalar_lea.vmem %s27_s20, 1280  ;;  %p730_p6 = scmp.lt.s32.totalorder %s27_s20, %s27_s20 }
  0x2e   :  { %p726_p5 = scmp.ne.s32.totalorder %s27_s20, %s725_s3  ;;  %p731_p7 = scmp.lt.s32.totalorder %s725_s3, %s725_s3 }
  0x30   :  { %p732_p8 = por %p731_p7, %p730_p6 }
  0x32   :  { %p733_p9 = pnand %p732_p8, %p726_p5 }
  0x34   :  { %736 = shalt.err (!%p733_p9)
}
  0x35   :  { %32 = dma.hbm_to_vmem [thread:$0]  %s1196_s0, 1280, %s27_s20, [#allocation3], %s891_s25, %s891_s25, %s892_s26  }
  0x36   :  { %s737_s17 = scalar_lea.hbm %s1198_s2, 512 }
  0x37   :  { %p738_p10 = scmp.ne.s32.totalorder %s1198_s2, %s737_s17  ;;  %p741_p11 = scmp.lt.u32.totalorder %s737_s17, %s1198_s2 }
  0x39   :  { %p743_p12 = pnand %p741_p11, %p738_p10 }
  0x3b   :  { %746 = shalt.err (!%p743_p12)
}
  0x3c   :  { %s747_s21 = scalar_lea.vmem %s1002_s22, 512  ;;  %p752_p0 = scmp.lt.s32.totalorder %s1002_s22, %s1002_s22 }
  0x3d   :  { %p748_p13 = scmp.ne.s32.totalorder %s1002_s22, %s747_s21  ;;  %p753_p1 = scmp.lt.s32.totalorder %s747_s21, %s747_s21 }
  0x3f   :  { %p754_p2 = por %p753_p1, %p752_p0 }
  0x41   :  { %p755_p3 = pnand %p754_p2, %p748_p13 }
  0x43   :  { %758 = shalt.err (!%p755_p3)
}
  0x44   :  { %56 = dma.hbm_to_vmem [thread:$0]  %s1198_s2, 512, %s1002_s22, [#allocation6], %s891_s25, %s891_s25, %s892_s26  }
  0x45   :  { %s895_s23 = smov [#allocation10]   ;;  %s759_s29 = scalar_lea.hbm %s1202_s6, 512 }
  0x46   :  { %s78_s24 = sshll.u32 %s895_s23, 4  ;;  %p760_p4 = scmp.ne.s32.totalorder %s1202_s6, %s759_s29  ;;  %s79_s24 = int_to_ptr.vmem [resolvable:$true] %s78_s24 }
  0x47   :  { %p763_p5 = scmp.lt.u32.totalorder %s759_s29, %s1202_s6 }
  0x49   :  { %p765_p6 = pnand %p763_p5, %p760_p4 }
  0x4b   :  { %768 = shalt.err (!%p765_p6)
}
  0x4c   :  { %s769_s12 = scalar_lea.vmem %s79_s24, 512  ;;  %p774_p8 = scmp.lt.s32.totalorder %s79_s24, %s79_s24 }
  0x4d   :  { %p770_p7 = scmp.ne.s32.totalorder %s79_s24, %s769_s12  ;;  %p775_p9 = scmp.lt.s32.totalorder %s769_s12, %s769_s12 }
  0x4f   :  { %p776_p10 = por %p775_p9, %p774_p8 }
  0x51   :  { %p777_p11 = pnand %p776_p10, %p770_p7 }
  0x53   :  { %780 = shalt.err (!%p777_p11)
}
  0x54   :  { %84 = dma.hbm_to_vmem [thread:$0]  %s1202_s6, 512, %s79_s24, [#allocation9], %s891_s25, %s891_s25, %s892_s26  }
  0x55   :  { %863 = dma.done.wait [#allocation3], 1280  }
  0x56   :  { %864 = vsyncadd [#allocation3], 4294966016 }
  0x57   :  { %865 = dma.done.wait [#allocation6], 1792  }
  0x58   :  { %866 = vsyncadd [#allocation6], 4294965504 }
  0x59   :  { %867 = dma.done.wait [#allocation9], 1024  }
  0x5a   :  { %868 = vsyncadd [#allocation9], 4294966272  ;;  %v1054_v0 = vld [vmem:[#allocation7] sm:$0xff]  ;;  %v1056_v1 = vld [vmem:[#allocation7 + $0x8] sm:$0xff]  ;;  %v873_v15 = vmov 0.0  }
  0x5b   :  { %v1058_v2 = vld [vmem:[#allocation7 + $0x10] sm:$0xff]  ;;  %v1060_v3 = vld [vmem:[#allocation7 + $0x18] sm:$0xff]  ;;  %v1062_v4 = vld [vmem:[#allocation8] sm:$0xff] }
  0x5c   :  { %v1064_v5 = vld [vmem:[#allocation8 + $0x8] sm:$0xff]  ;;  %v1066_v6 = vld [vmem:[#allocation8 + $0x10] sm:$0xff]  ;;  %v1068_v7 = vld [vmem:[#allocation8 + $0x18] sm:$0xff] }
  0x5d   :  { %v1073_v8 = vld [vmem:[%s1200_s4] ss:$0 sm:$0xff]  ;;  %v1082_v11 = vld [vmem:[#allocation10 + $0x8] sm:$0xff]  ;;  %v1084_v12 = vld [vmem:[#allocation10 + $0x10] sm:$0xff]  ;;  %s1093_s4 = smov 0  }
  0x5e   :  { %v1078_v9 = vld [vmem:[%s1201_s5] ss:$0 sm:$0xff]  ;;  %v1086_v13 = vld [vmem:[#allocation10 + $0x18] sm:$0xff] }
  0x5f   :  { %v1080_v10 = vld [vmem:[#allocation10] sm:$0xff] }
  0x60   :  { %v1091_v14 = vld [vmem:[%s1203_s7] ss:$0 sm:$0xff] }
  0x61 LB: > { %v589_v16 = vpack.c.bf16 %v1056_v1, %v1054_v0  ;;  %v896_v17 = vmov 0.0|0.0   ;;  %s897_s5 = smov 96   ;;  %v592_v18 = vpack.c.bf16 %v1060_v3, %v1058_v2  ;;  %vm898_vm0 = vmmov 0   ;;  %s900_s7 = smov 64   ;;  %s879_s4 = sphi %s1093_s4, %s122_s4   ;;  %v875_v15 = vphi %v873_v15, %v874_v15  }
  0x62   : > { %588 = vmatprep.subr.bf16.mxu0 %v896_v17  ;;  %134 = vrot.lane.b32.xlu0 %v875_v15, %s897_s5  ;;  %v899_v19 = vmov 0.0   ;;  %vm136_vm1 = vcmask 261120   ;;  %s530_s14 = sshll.u32 %s879_s4, 3  ;;  %s122_s4 = sadd.s32 1, %s879_s4  }
  0x63   : > { %590 = vmatpush3.bf16.msra.mxu0 %v589_v16  ;;  %563 = vmatprep.mubr.msk.f32.mxu0 %vm898_vm0, %v899_v19  ;;  %s125_s19 = scalar_lea.vmem [#allocation2], %s530_s14  ;;  %s239_s21 = scalar_lea.vmem [#allocation11], %s530_s14 }
  0x64   : > { %591 = vmatprep.subr.bf16.mxu0 %v896_v17  ;;  %v126_v24 = vld [vmem:[%s125_s19] sm:$0xff]  ;;  %p119_p12 = scmp.ge.s32.totalorder %s122_s4, 10  }
  0x65   :  { %v1116_v41 = vmov (%p119_p12), 0.0   ;;  %s1118_s0 = smov (%p119_p12), 0  }
  0x67   : > { %593 = vmatpush3.bf16.msra.mxu0 %v592_v18 }
  0xd4   : > { %v135_v20 = vpop.permute.xlu0 %134 }
  0xd5   : > { %564 = vmatmul.mubr.msk.f32.vlgmr.msra.gmra.mrb[0].mxu0 %vm136_vm1, %v135_v20 }
 0x1a8   : > { %v205_v21 = vpop.f32.mrb[0].mxu0 }
 0x1a9   : > { %v206_v22 = vadd.f32 %v1073_v8, %v205_v21  ;;  %v565_v23 = vpop.f32.mrb[1].mxu0 }
 0x1ab   : > { %217 = vrot.lane.b32.xlu0 %v206_v22, %s900_s7  ;;  %v209_v25 = vadd.f32 %v206_v22, %v126_v24 }
 0x1ad   : > { %v533_v26 = vmul.f32 -1.442695, %v209_v25 }
 0x1af   : > { %659 = vpow2.f32 %v533_v26 }
 0x1b9   : > { %v660_v27 = vpop.eup %659 }
 0x1ba   : > { %v213_v28 = vadd.f32 1.0, %v660_v27 }
 0x1bc   : > { %661 = vrcp.f32 %v213_v28 }
 0x1c6   : > { %v662_v29 = vpop.eup %661 }
 0x1c7   : > { %v227_v35 = vsub.f32 1.0, %v662_v29  ;;  %v233_v37 = vmul.f32 %v875_v15, %v662_v29 }
 0x21d   : > { %v218_v30 = vpop.permute.xlu0 %217 }
 0x21e   : > { %v220_v31 = vmul.f32 %v662_v29, %v218_v30 }
 0x220   : > { %222 = vrot.lane.b32.xlu1 %v220_v31, %s900_s7 }
 0x292   : > { %v223_v32 = vpop.permute.xlu1 %222 }
 0x293   : > { %v225_v33 = vadd.f32 %v223_v32, %v126_v24 }
 0x295   : > { %663 = vtanh.f32 %v225_v33 }
 0x29f   : > { %v664_v34 = vpop.eup %663 }
 0x2a0   : > { %229 = vrot.lane.b32.xlu1 %v664_v34, %s897_s5 }
 0x312   : > { %v230_v36 = vpop.permute.xlu1 %229 }
 0x313   : > { %v232_v38 = vmul.f32 %v230_v36, %v227_v35 }
 0x315   : > { %v1107_v15 = vadd.f32 %v233_v37, %v232_v38  }
 0x317   : > { %v1207_v39 = vmov %v1107_v15 }
 0x318   : > { %236 = vrot.lane.b32.xlu0 %v1207_v39, %s897_s5  ;;  %v874_v15 = vmov %v1207_v39  }
 0x385   :  { %121 = sbr.rel (!%p119_p12) target bundleno = 97 (0x61), region = 107 }
 0x38a   : > { %v237_v40 = vpop.permute.xlu0 %236 }
 0x38b   : > { %240 = vst.msk [vmem:[%s239_s21] sm:$0xff] %vm136_vm1, %v237_v40 }
 0x38c LB: > { %v595_v42 = vpack.c.bf16 %v1064_v5, %v1062_v4  ;;  %v901_v43 = vmov 0.0|0.0   ;;  %s902_s20 = smov 96   ;;  %v598_v44 = vpack.c.bf16 %v1068_v7, %v1066_v6  ;;  %vm903_vm2 = vmmov 0   ;;  %s905_s23 = smov 64   ;;  %s887_s0 = sphi %s1118_s0, %s246_s0   ;;  %v883_v41 = vphi %v1116_v41, %v1208_v41  }
 0x38d   : > { %594 = vmatprep.subr.bf16.mxu0 %v901_v43  ;;  %600 = vmatprep.subr.bf16.mxu1 %v901_v43  ;;  %v904_v45 = vmov 0.0   ;;  %s248_s24 = ssub.s32 9, %s887_s0  ;;  %v601_v60 = vpack.c.bf16 %v1082_v11, %v1080_v10  ;;  %v604_v61 = vpack.c.bf16 %v1086_v13, %v1084_v12  ;;  %s246_s0 = sadd.s32 1, %s887_s0  }
 0x38e   : > { %259 = vrot.lane.b32.xlu0 %v883_v41, %s902_s20  ;;  %596 = vmatpush3.bf16.msra.mxu0 %v595_v42  ;;  %s1132_s27 = sshll.u32 %s248_s24, 3  ;;  %p243_p13 = scmp.ge.s32.totalorder %s246_s0, 10  }
 0x38f   : > { %597 = vmatprep.subr.bf16.mxu0 %v901_v43  ;;  %574 = vmatprep.mubr.msk.f32.mxu0 %vm903_vm2, %v904_v45  ;;  %s250_s28 = scalar_lea.vmem [#allocation5], %s1132_s27  ;;  %s360_s29 = scalar_lea.vmem [#allocation11], %s1132_s27 }
 0x390   : > { %585 = vmatprep.mubr.msk.f32.mxu1 %vm903_vm2, %v904_v45  ;;  %v251_v50 = vld [vmem:[%s250_s28] sm:$0xff]  ;;  %602 = vmatpush3.bf16.msra.mxu1 %v601_v60  ;;  %s447_s30 = scalar_lea.vmem [#allocation12], %s1132_s27  ;;  %s906_s11 = smov (%p243_p13), [#allocation12]  }
 0x391   : > { %603 = vmatprep.subr.bf16.mxu1 %v901_v43  ;;  %s473_s3 = sshll.u32 (%p243_p13), %s906_s11, 4  ;;  %s907_s16 = smov (%p243_p13), 96   ;;  %s474_s3 = int_to_ptr.vmem [resolvable:$true] %s473_s3 }
 0x392   : > { %599 = vmatpush3.bf16.msra.mxu0 %v598_v44  ;;  %v361_v8 = vld [vmem:[%s360_s29] sm:$0xff]  ;;  %s908_s12 = smov (%p243_p13), [#allocation11]   ;;  %s781_s22 = scalar_lea.vmem (%p243_p13), %s474_s3, 1280 }
 0x393   :  { %s461_s2 = sshll.u32 (%p243_p13), %s908_s12, 4  ;;  %p782_p0 = scmp.ne.s32.totalorder (%p243_p13), %s474_s3, %s781_s22  ;;  %s462_s2 = int_to_ptr.vmem [resolvable:$true] %s461_s2 }
 0x394   : > { %605 = vmatpush3.bf16.msra.mxu1 %v604_v61  ;;  %p786_p1 = scmp.lt.s32.totalorder (%p243_p13), %s474_s3, %s474_s3  ;;  %p787_p2 = scmp.lt.s32.totalorder (%p243_p13), %s781_s22, %s781_s22 }
 0x396   :  { %p788_p3 = por (%p243_p13), %p787_p2, %p786_p1 }
 0x398   :  { %p789_p4 = pnand (%p243_p13), %p788_p3, %p782_p0 }
 0x400   : > { %v260_v46 = vpop.permute.xlu0 %259 }
 0x401   : > { %575 = vmatmul.mubr.msk.f32.vlgmr.msra.gmra.mrb[0].mxu0 %vm136_vm1, %v260_v46 }
 0x4d4   : > { %v330_v47 = vpop.f32.mrb[0].mxu0 }
 0x4d5   : > { %v331_v48 = vadd.f32 %v1078_v9, %v330_v47  ;;  %v576_v49 = vpop.f32.mrb[1].mxu0 }
 0x4d7   : > { %342 = vrot.lane.b32.xlu0 %v331_v48, %s905_s23  ;;  %v334_v51 = vadd.f32 %v331_v48, %v251_v50 }
 0x4d9   : > { %v537_v52 = vmul.f32 -1.442695, %v334_v51 }
 0x4db   : > { %665 = vpow2.f32 %v537_v52 }
 0x4e5   : > { %v666_v53 = vpop.eup %665 }
 0x4e6   : > { %v338_v54 = vadd.f32 1.0, %v666_v53 }
 0x4e8   : > { %667 = vrcp.f32 %v338_v54 }
 0x4f2   : > { %v668_v55 = vpop.eup %667 }
 0x4f3   : > { %v352_v63 = vsub.f32 1.0, %v668_v55  ;;  %v358_v1 = vmul.f32 %v883_v41, %v668_v55 }
 0x549   : > { %v343_v56 = vpop.permute.xlu0 %342 }
 0x54a   : > { %v345_v57 = vmul.f32 %v668_v55, %v343_v56 }
 0x54c   : > { %347 = vrot.lane.b32.xlu1 %v345_v57, %s905_s23 }
 0x5be   : > { %v348_v58 = vpop.permute.xlu1 %347 }
 0x5bf   : > { %v350_v59 = vadd.f32 %v348_v58, %v251_v50 }
 0x5c1   : > { %669 = vtanh.f32 %v350_v59 }
 0x5cb   : > { %v670_v62 = vpop.eup %669 }
 0x5cc   : > { %354 = vrot.lane.b32.xlu1 %v670_v62, %s902_s20 }
 0x63e   : > { %v355_v0 = vpop.permute.xlu1 %354 }
 0x63f   : > { %v357_v2 = vmul.f32 %v355_v0, %v352_v63 }
 0x641   : > { %v359_v3 = vadd.f32 %v358_v1, %v357_v2  }
 0x643   : > { %363 = vrot.lane.b32.xlu0 %v359_v3, %s902_s20  ;;  %v1208_v41 = vmov %v359_v3  ;;  %v449_v20 = vadd.f32 (%p243_p13), %v359_v3, %v1207_v39 }
 0x647   :  { %451 = vrot.lane.b32.xlu0 (%p243_p13), %v449_v20, %s907_s16 }
 0x6b5   : > { %v364_v15 = vpop.permute.xlu0 %363 }
 0x6b6   : > { %v366_v16 = vadd.f32 %v364_v15, %v361_v8 }
 0x6b8   : > { %367 = vst.msk [vmem:[%s360_s29] sm:$0xff] %vm136_vm1, %v366_v16  ;;  %586 = vmatmul.mubr.msk.f32.vlgmr.msra.gmra.mrb[0].mxu1 %vm136_vm1, %v366_v16 }
 0x788   :  { %245 = sbr.rel (!%p243_p13) target bundleno = 908 (0x38c), region = 118 }
 0x78b   : > { %v443_v17 = vpop.f32.mrb[0].mxu1 }
 0x78c   : > { %v444_v18 = vadd.f32 %v1091_v14, %v443_v17  ;;  %v587_v19 = vpop.f32.mrb[1].mxu1 }
 0x78e   : > { %448 = vst.msk [vmem:[%s447_s30] sm:$0xff] %vm136_vm1, %v444_v18 }
 0x78f   :  { %792 = shalt.err (!%p789_p4)
}
 0x790   :  { %s793_s15 = scalar_lea.hbm %s1205_s9, 1280 }
 0x791   :  { %p794_p5 = scmp.ne.s32.totalorder %s1205_s9, %s793_s15  ;;  %p797_p6 = scmp.lt.u32.totalorder %s793_s15, %s1205_s9 }
 0x793   :  { %p799_p7 = pnand %p797_p6, %p794_p5 }
 0x795   :  { %802 = shalt.err (!%p799_p7)
}
 0x796   :  { %479 = dma.vmem_to_hbm [thread:$0]  %s474_s3, 1280, %s1205_s9, [#allocation13], %s891_s25, %s891_s25, %s892_s26  }
 0x797   :  { %s803_s14 = scalar_lea.vmem %s462_s2, 1280  ;;  %p808_p9 = scmp.lt.s32.totalorder %s462_s2, %s462_s2 }
 0x798   :  { %p804_p8 = scmp.ne.s32.totalorder %s462_s2, %s803_s14  ;;  %p809_p10 = scmp.lt.s32.totalorder %s803_s14, %s803_s14 }
 0x79a   :  { %p810_p11 = por %p809_p10, %p808_p9 }
 0x79c   :  { %p811_p12 = pnand %p810_p11, %p804_p8 }
 0x79e   :  { %814 = shalt.err (!%p811_p12)
}
 0x79f   :  { %s815_s0 = scalar_lea.hbm %s1204_s8, 1280 }
 0x7a0   :  { %p816_p13 = scmp.ne.s32.totalorder %s1204_s8, %s815_s0  ;;  %p819_p0 = scmp.lt.u32.totalorder %s815_s0, %s1204_s8 }
 0x7a2   :  { %p821_p1 = pnand %p819_p0, %p816_p13 }
 0x7a4   :  { %824 = shalt.err (!%p821_p1)
}
 0x7a5   :  { %467 = dma.vmem_to_hbm [thread:$0]  %s462_s2, 1280, %s1204_s8, [#allocation4], %s891_s25, %s891_s25, %s892_s26   ;;  %v452_v4 = vpop.permute.xlu0 %451 }
 0x7a6   :  { %s909_s29 = smov [#allocation14]   ;;  %455 = vst.msk [vmem:[#allocation14] sm:$0xff] %vm136_vm1, %v452_v4 }
 0x7a7   :  { %s486_s30 = sshll.u32 %s909_s29, 4  ;;  %s487_s30 = int_to_ptr.vmem [resolvable:$true] %s486_s30 }
 0x7a8   :  { %s825_s11 = scalar_lea.vmem %s487_s30, 128  ;;  %p830_p3 = scmp.lt.s32.totalorder %s487_s30, %s487_s30 }
 0x7a9   :  { %p826_p2 = scmp.ne.s32.totalorder %s487_s30, %s825_s11  ;;  %p831_p4 = scmp.lt.s32.totalorder %s825_s11, %s825_s11 }
 0x7ab   :  { %p832_p5 = por %p831_p4, %p830_p3 }
 0x7ad   :  { %p833_p6 = pnand %p832_p5, %p826_p2 }
 0x7af   :  { %836 = shalt.err (!%p833_p6)
}
 0x7b0   :  { %s837_s12 = scalar_lea.hbm %s1206_s10, 128 }
 0x7b1   :  { %p838_p7 = scmp.ne.s32.totalorder %s1206_s10, %s837_s12  ;;  %p841_p8 = scmp.lt.u32.totalorder %s837_s12, %s1206_s10 }
 0x7b3   :  { %p843_p9 = pnand %p841_p8, %p838_p7 }
 0x7b5   :  { %846 = shalt.err (!%p843_p9)
}
 0x7b6   :  { %489 = dma.vmem_to_hbm [thread:$0]  %s487_s30, 128, %s1206_s10, [#allocation13]  }
 0x7b7   :  { %869 = dma.done.wait [#allocation4], 1280  }
 0x7b8   :  { %870 = vsyncadd [#allocation4], 4294966016 }
 0x7b9   :  { %871 = dma.done.wait [#allocation13], 1408  }
 0x7ba   :  { %872 = vsyncadd [#allocation13], 4294965888 }
 0x7bb   :  { %499 = vsyncpa [#allocation3], 1 }
 0x7bc   :  { %500 = vsyncpa [#allocation6], 1 }
 0x7bd   :  { %501 = vsyncpa [#allocation9], 1 }
 0x7be   :  { %502 = vsyncpa [#allocation4], 1 }
 0x7bf   :  { %503 = vsyncpa [#allocation13], 1 }

</bundles_post_ra>
